<compile_context>
chip_gen: v5e
topology: v5e:2x2
jax: 0.10.0
libtpu: 0.0.40
codegen_flags: <defaults>
</compile_context>

<pallas_src>
import functools

import jax
import jax.numpy as jnp
from jax.experimental import pallas as pl
from jax.experimental.pallas import tpu as pltpu

LANE = 128      # vreg lane width
SUBLANE = 8     # f32 sublane count


def _round_up(n, m):
    return ((n + m - 1) // m) * m


def _fused_mlp_kernel(*refs, n_layers):
    """refs = (x, w0, b0, w1, b1, ..., w_{L-1}, b_{L-1}, out).

    x and w_i are in the compute dtype (bf16); biases and the output are f32.
    Weights are pre-transposed to (in, out): each matmul is a plain NN dot on the MXU
    (no in-kernel transpose).  The hidden activation never leaves vregs.
    """
    x_ref = refs[0]
    o_ref = refs[1 + 2 * n_layers]
    compute_dtype = x_ref.dtype

    h = x_ref[...]
    for i in range(n_layers):
        w_ref = refs[1 + 2 * i]
        b_ref = refs[2 + 2 * i]
        # MXU matmul with f32 accumulation; bias (1, out_pad) broadcasts over rows.
        y = jnp.dot(h, w_ref[...], preferred_element_type=jnp.float32) + b_ref[...]
        if i < n_layers - 1:
            h = jnp.maximum(y, 0.0).astype(compute_dtype)   # stays in vregs
        else:
            o_ref[...] = y.astype(o_ref.dtype)               # final layer: no ReLU


def init_mlp_params(key, in_size, out_size, width, depth):
    """PyTorch nn.Linear-style init: W (out, in), b (out,), U(-1/sqrt(fan_in), +...)."""
    dims = [(in_size, width)] + [(width, width)] * depth + [(width, out_size)]
    params = []
    for fan_in, fan_out in dims:
        key, kw, kb = jax.random.split(key, 3)
        bound = 1.0 / jnp.sqrt(jnp.float32(fan_in))
        w = jax.random.uniform(kw, (fan_out, fan_in), jnp.float32, -bound, bound)
        b = jax.random.uniform(kb, (fan_out,), jnp.float32, -bound, bound)
        params.append((w, b))
    return params


def prepare_mlp_params(params, compute_dtype=jnp.bfloat16):
    """One-time preparation (call ONCE, cache the result, pass it to mlp_forward):
    pre-transpose (out,in) -> (in,out), zero-pad both dims to lane multiples, cast
    weights to the compute dtype.  Biases stay f32, shaped (1, out_pad)."""
    prepared = []
    for w, b in params:
        out_f, in_f = w.shape
        in_p = _round_up(in_f, LANE)
        out_p = _round_up(out_f, LANE)
        wt = jnp.pad(w.T, ((0, in_p - in_f), (0, out_p - out_f))).astype(compute_dtype)
        bp = jnp.pad(b.reshape(1, -1), ((0, 0), (0, out_p - out_f))).astype(jnp.float32)
        prepared.append((wt, bp))
    return prepared


def mlp_forward(x, prepared, out_size, compute_dtype=jnp.bfloat16):
    """Matches nn.Sequential(Flatten, Linear, ReLU, [Linear, ReLU]*depth, Linear).

    `prepared` is the output of prepare_mlp_params (already transposed/padded/cast);
    `out_size` is the un-padded output width of the last layer.
    """
    B = x.shape[0]
    n_layers = len(prepared)
    in_p = prepared[0][0].shape[0]        # padded flattened-input size
    out_p = prepared[-1][0].shape[1]      # padded output size

    # Batch tiling: rows padded to the sublane multiple; tiles of up to 256 rows so a
    # large batch shards across v7x's two TensorCores ("parallel" axis).  At tiny batch
    # this degenerates to one grid point.
    B_p = max(_round_up(B, SUBLANE), SUBLANE)
    tm = min(B_p, 256)
    B_p = _round_up(B_p, tm)
    grid = (B_p // tm,)

    # nn.Flatten (start_dim=1), zero-pad batch/feature dims, cast to bf16 outside the
    # kernel so the HBM->VMEM input DMA moves half the bytes.
    xf = x.reshape(B, -1).astype(compute_dtype)
    x_pad = jnp.pad(xf, ((0, B_p - B), (0, in_p - xf.shape[1])))

    flat_args = [x_pad]
    in_specs = [pl.BlockSpec((tm, in_p), lambda i: (i, 0))]
    for wt, bp in prepared:
        flat_args += [wt, bp]
        # Constant index_map -> weights/biases are DMA'd once and stay VMEM-resident
        # across batch tiles (pipeline skips re-fetch on unchanged block index).
        in_specs += [pl.BlockSpec(wt.shape, lambda i: (0, 0)),
                     pl.BlockSpec(bp.shape, lambda i: (0, 0))]
    out_spec = pl.BlockSpec((tm, out_p), lambda i: (i, 0))

    flops = 2 * B_p * sum(int(w.shape[0]) * int(w.shape[1]) for w, _ in prepared)
    bytes_accessed = (sum(int(a.size) * a.dtype.itemsize for a in flat_args)
                      + B_p * out_p * 4)

    # VMEM budget: double-buffered x/out tiles + resident weights + headroom.
    x_tile_b = tm * in_p * jnp.dtype(compute_dtype).itemsize
    o_tile_b = tm * out_p * 4
    w_bytes = sum(int(w.size) * w.dtype.itemsize + int(b.size) * b.dtype.itemsize
                  for w, b in prepared)
    vmem_limit = min(max(2 * (x_tile_b + o_tile_b) + w_bytes + (4 << 20), 32 << 20),
                     64 << 20)

    kernel = functools.partial(_fused_mlp_kernel, n_layers=n_layers)

    out_pad = pl.pallas_call(
        kernel,
        out_shape=jax.ShapeDtypeStruct((B_p, out_p), jnp.float32),
        grid=grid,
        in_specs=in_specs,
        out_specs=out_spec,
        compiler_params=pltpu.CompilerParams(
            dimension_semantics=("parallel",),
            vmem_limit_bytes=int(vmem_limit)),
        cost_estimate=pl.CostEstimate(
            flops=flops, transcendentals=0, bytes_accessed=bytes_accessed),
    )(*flat_args)

    # Strip the zero padding back off.
    return out_pad[:B, :out_size]


if __name__ == "__main__":
    # Small shapes consistent with the module: image-like input flattened by nn.Flatten.
    B, C, H, W = 2, 4, 16, 16
    in_size = C * H * W          # 1024
    width, depth, out_size = 32, 2, 8

    key = jax.random.PRNGKey(0)
    key_x, key_p = jax.random.split(key)
    x = jax.random.normal(key_x, (B, C, H, W), dtype=jnp.float32)
    params = init_mlp_params(key_p, in_size, out_size, width, depth)

    # One-time weight preparation (transpose + pad + bf16 cast), kept OUT of the
    # per-call jitted forward.
    prepared = prepare_mlp_params(params)
    prepared = jax.block_until_ready(prepared)

    fwd = jax.jit(functools.partial(mlp_forward, out_size=out_size))
    y = fwd(x, prepared)
    jax.block_until_ready(y)
    assert y.shape == (B, out_size)

    # (1) Tight check vs a bf16-emulated JAX reference (same math the kernel does:
    #     bf16 operands, f32 accumulation, f32 bias+ReLU).
    h_bf = x.reshape(B, -1).astype(jnp.bfloat16)
    ref_bf16 = None
    for i, (w, b) in enumerate(params):
        h_f = jnp.dot(h_bf, w.T.astype(jnp.bfloat16),
                      preferred_element_type=jnp.float32) + b
        if i < len(params) - 1:
            h_f = jnp.maximum(h_f, 0.0)
            h_bf = h_f.astype(jnp.bfloat16)
        ref_bf16 = h_f
    assert jnp.allclose(y, ref_bf16, atol=1e-3, rtol=1e-3)

    # (2) Looser semantic check vs the plain f32 reference (the PyTorch module math).
    h_ref = x.reshape(B, -1)
    for i, (w, b) in enumerate(params):
        h_ref = h_ref @ w.T + b
        if i < len(params) - 1:
            h_ref = jnp.maximum(h_ref, 0.0)
    assert jnp.allclose(y, h_ref, atol=5e-2, rtol=5e-2)

    print("KERNEL_OK")
</pallas_src>

<mosaic_0001>
module attributes {stable_mosaic.version = 11 : i64} {
  func.func @_fused_mlp_kernel(%arg0: i32, %arg1: memref<8x1024xbf16, #tpu.memory_space<vmem>>, %arg2: memref<1024x128xbf16, #tpu.memory_space<vmem>>, %arg3: memref<1x128xf32, #tpu.memory_space<vmem>>, %arg4: memref<128x128xbf16, #tpu.memory_space<vmem>>, %arg5: memref<1x128xf32, #tpu.memory_space<vmem>>, %arg6: memref<128x128xbf16, #tpu.memory_space<vmem>>, %arg7: memref<1x128xf32, #tpu.memory_space<vmem>>, %arg8: memref<128x128xbf16, #tpu.memory_space<vmem>>, %arg9: memref<1x128xf32, #tpu.memory_space<vmem>>, %arg10: memref<8x128xf32, #tpu.memory_space<vmem>>) attributes {dimension_semantics = [#tpu.dimension_semantics<parallel>], iteration_bounds = array<i64: 1>, scalar_prefetch = 0 : i64, scratch_operands = 0 : i64, tpu.core_type = #tpu.core_type<tc>, window_params = [{transform_indices = @transform_0, window_bounds = array<i64: 8, 1024>}, {pipeline_mode = #tpu.pipeline_mode<synchronous>, transform_indices = @transform_1, window_bounds = array<i64: 1024, 128>}, {pipeline_mode = #tpu.pipeline_mode<synchronous>, transform_indices = @transform_2, window_bounds = array<i64: 1, 128>}, {pipeline_mode = #tpu.pipeline_mode<synchronous>, transform_indices = @transform_3, window_bounds = array<i64: 128, 128>}, {pipeline_mode = #tpu.pipeline_mode<synchronous>, transform_indices = @transform_4, window_bounds = array<i64: 1, 128>}, {pipeline_mode = #tpu.pipeline_mode<synchronous>, transform_indices = @transform_5, window_bounds = array<i64: 128, 128>}, {pipeline_mode = #tpu.pipeline_mode<synchronous>, transform_indices = @transform_6, window_bounds = array<i64: 1, 128>}, {pipeline_mode = #tpu.pipeline_mode<synchronous>, transform_indices = @transform_7, window_bounds = array<i64: 128, 128>}, {pipeline_mode = #tpu.pipeline_mode<synchronous>, transform_indices = @transform_8, window_bounds = array<i64: 1, 128>}, {transform_indices = @transform_9, window_bounds = array<i64: 8, 128>}]} {
    %c0 = arith.constant 0 : index
    %c0_0 = arith.constant 0 : index
    %0 = vector.load %arg1[%c0, %c0_0] : memref<8x1024xbf16, #tpu.memory_space<vmem>>, vector<8x1024xbf16>
    %c0_1 = arith.constant 0 : index
    %c0_2 = arith.constant 0 : index
    %1 = vector.load %arg2[%c0_1, %c0_2] : memref<1024x128xbf16, #tpu.memory_space<vmem>>, vector<1024x128xbf16>
    %cst = arith.constant dense<0.000000e+00> : vector<8x128xf32>
    %2 = tpu.matmul %0, %1, %cst {dimension_numbers = #tpu.dot_dimension_numbers<[1], [0], [0], [1], [0, 0, 1, 1], [], []>} : vector<8x1024xbf16>, vector<1024x128xbf16>, vector<8x128xf32> -> vector<8x128xf32>
    %c0_3 = arith.constant 0 : index
    %c0_4 = arith.constant 0 : index
    %3 = vector.load %arg3[%c0_3, %c0_4] : memref<1x128xf32, #tpu.memory_space<vmem>>, vector<1x128xf32>
    %4 = vector.broadcast %3 : vector<1x128xf32> to vector<8x128xf32>
    %5 = arith.addf %2, %4 : vector<8x128xf32>
    %cst_5 = arith.constant 0.000000e+00 : f32
    %6 = vector.broadcast %cst_5 : f32 to vector<8x128xf32>
    %7 = arith.maximumf %5, %6 : vector<8x128xf32>
    %8 = arith.truncf %7 : vector<8x128xf32> to vector<8x128xbf16>
    %c0_6 = arith.constant 0 : index
    %c0_7 = arith.constant 0 : index
    %9 = vector.load %arg4[%c0_6, %c0_7] : memref<128x128xbf16, #tpu.memory_space<vmem>>, vector<128x128xbf16>
    %cst_8 = arith.constant dense<0.000000e+00> : vector<8x128xf32>
    %10 = tpu.matmul %8, %9, %cst_8 {dimension_numbers = #tpu.dot_dimension_numbers<[1], [0], [0], [1], [0, 0, 1, 1], [], []>} : vector<8x128xbf16>, vector<128x128xbf16>, vector<8x128xf32> -> vector<8x128xf32>
    %c0_9 = arith.constant 0 : index
    %c0_10 = arith.constant 0 : index
    %11 = vector.load %arg5[%c0_9, %c0_10] : memref<1x128xf32, #tpu.memory_space<vmem>>, vector<1x128xf32>
    %12 = vector.broadcast %11 : vector<1x128xf32> to vector<8x128xf32>
    %13 = arith.addf %10, %12 : vector<8x128xf32>
    %cst_11 = arith.constant 0.000000e+00 : f32
    %14 = vector.broadcast %cst_11 : f32 to vector<8x128xf32>
    %15 = arith.maximumf %13, %14 : vector<8x128xf32>
    %16 = arith.truncf %15 : vector<8x128xf32> to vector<8x128xbf16>
    %c0_12 = arith.constant 0 : index
    %c0_13 = arith.constant 0 : index
    %17 = vector.load %arg6[%c0_12, %c0_13] : memref<128x128xbf16, #tpu.memory_space<vmem>>, vector<128x128xbf16>
    %cst_14 = arith.constant dense<0.000000e+00> : vector<8x128xf32>
    %18 = tpu.matmul %16, %17, %cst_14 {dimension_numbers = #tpu.dot_dimension_numbers<[1], [0], [0], [1], [0, 0, 1, 1], [], []>} : vector<8x128xbf16>, vector<128x128xbf16>, vector<8x128xf32> -> vector<8x128xf32>
    %c0_15 = arith.constant 0 : index
    %c0_16 = arith.constant 0 : index
    %19 = vector.load %arg7[%c0_15, %c0_16] : memref<1x128xf32, #tpu.memory_space<vmem>>, vector<1x128xf32>
    %20 = vector.broadcast %19 : vector<1x128xf32> to vector<8x128xf32>
    %21 = arith.addf %18, %20 : vector<8x128xf32>
    %cst_17 = arith.constant 0.000000e+00 : f32
    %22 = vector.broadcast %cst_17 : f32 to vector<8x128xf32>
    %23 = arith.maximumf %21, %22 : vector<8x128xf32>
    %24 = arith.truncf %23 : vector<8x128xf32> to vector<8x128xbf16>
    %c0_18 = arith.constant 0 : index
    %c0_19 = arith.constant 0 : index
    %25 = vector.load %arg8[%c0_18, %c0_19] : memref<128x128xbf16, #tpu.memory_space<vmem>>, vector<128x128xbf16>
    %cst_20 = arith.constant dense<0.000000e+00> : vector<8x128xf32>
    %26 = tpu.matmul %24, %25, %cst_20 {dimension_numbers = #tpu.dot_dimension_numbers<[1], [0], [0], [1], [0, 0, 1, 1], [], []>} : vector<8x128xbf16>, vector<128x128xbf16>, vector<8x128xf32> -> vector<8x128xf32>
    %c0_21 = arith.constant 0 : index
    %c0_22 = arith.constant 0 : index
    %27 = vector.load %arg9[%c0_21, %c0_22] : memref<1x128xf32, #tpu.memory_space<vmem>>, vector<1x128xf32>
    %28 = vector.broadcast %27 : vector<1x128xf32> to vector<8x128xf32>
    %29 = arith.addf %26, %28 : vector<8x128xf32>
    %c0_23 = arith.constant 0 : index
    %c0_24 = arith.constant 0 : index
    %30 = vector.load %arg10[%c0_23, %c0_24] : memref<8x128xf32, #tpu.memory_space<vmem>>, vector<8x128xf32>
    tpu.vector_store %arg10[%c0_23, %c0_24], %29 {strides = array<i32>} : memref<8x128xf32, #tpu.memory_space<vmem>>, vector<8x128xf32>,
    return
  }
  func.func @transform_0(%arg0: i32) -> (i32, i32) {
    %c0_i32 = arith.constant 0 : i32
    %c0_i32_0 = arith.constant 0 : i32
    return %arg0, %c0_i32 : i32, i32
  }
  func.func @transform_1(%arg0: i32) -> (i32, i32) {
    %c0_i32 = arith.constant 0 : i32
    %c0_i32_0 = arith.constant 0 : i32
    %c0_i32_1 = arith.constant 0 : i32
    return %c0_i32, %c0_i32_0 : i32, i32
  }
  func.func @transform_2(%arg0: i32) -> (i32, i32) {
    %c0_i32 = arith.constant 0 : i32
    %c0_i32_0 = arith.constant 0 : i32
    %c0_i32_1 = arith.constant 0 : i32
    return %c0_i32, %c0_i32_0 : i32, i32
  }
  func.func @transform_3(%arg0: i32) -> (i32, i32) {
    %c0_i32 = arith.constant 0 : i32
    %c0_i32_0 = arith.constant 0 : i32
    %c0_i32_1 = arith.constant 0 : i32
    return %c0_i32, %c0_i32_0 : i32, i32
  }
  func.func @transform_4(%arg0: i32) -> (i32, i32) {
    %c0_i32 = arith.constant 0 : i32
    %c0_i32_0 = arith.constant 0 : i32
    %c0_i32_1 = arith.constant 0 : i32
    return %c0_i32, %c0_i32_0 : i32, i32
  }
  func.func @transform_5(%arg0: i32) -> (i32, i32) {
    %c0_i32 = arith.constant 0 : i32
    %c0_i32_0 = arith.constant 0 : i32
    %c0_i32_1 = arith.constant 0 : i32
    return %c0_i32, %c0_i32_0 : i32, i32
  }
  func.func @transform_6(%arg0: i32) -> (i32, i32) {
    %c0_i32 = arith.constant 0 : i32
    %c0_i32_0 = arith.constant 0 : i32
    %c0_i32_1 = arith.constant 0 : i32
    return %c0_i32, %c0_i32_0 : i32, i32
  }
  func.func @transform_7(%arg0: i32) -> (i32, i32) {
    %c0_i32 = arith.constant 0 : i32
    %c0_i32_0 = arith.constant 0 : i32
    %c0_i32_1 = arith.constant 0 : i32
    return %c0_i32, %c0_i32_0 : i32, i32
  }
  func.func @transform_8(%arg0: i32) -> (i32, i32) {
    %c0_i32 = arith.constant 0 : i32
    %c0_i32_0 = arith.constant 0 : i32
    %c0_i32_1 = arith.constant 0 : i32
    return %c0_i32, %c0_i32_0 : i32, i32
  }
  func.func @transform_9(%arg0: i32) -> (i32, i32) {
    %c0_i32 = arith.constant 0 : i32
    %c0_i32_0 = arith.constant 0 : i32
    return %arg0, %c0_i32 : i32, i32
  }
}

</mosaic_0001>

<bundles_post_ra>
// kernel: mlp_forward.1
= control target key start
LH: loop header
LB: loop body
LE: loop exit
PB: predicated region body
PF: predicated region fallthrough
CT: control target
= control target key end

     0   :  { %14 = vsyncpa [#allocation3], 0  ;;  %s1428_s12 = smov [#allocation2]   ;;  %s1429_s14 = smov 64   ;;  %s1583_s0 = inlined_call_operand.vmem [shape: bf16[8,1024], index: 0, kind: input, shape index: {}]   ;;  %s1584_s1 = inlined_call_operand.hbm [shape: bf16[1024,128], index: 1, kind: input, shape index: {}]   ;;  %s1585_s2 = inlined_call_operand.vmem [shape: f32[1,128], index: 2, kind: input, shape index: {}]   ;;  %s1586_s3 = inlined_call_operand.vmem [shape: bf16[128,128], index: 3, kind: input, shape index: {}]   ;;  %s1587_s4 = inlined_call_operand.vmem [shape: f32[1,128], index: 4, kind: input, shape index: {}]   ;;  %s1588_s5 = inlined_call_operand.vmem [shape: bf16[128,128], index: 5, kind: input, shape index: {}]   ;;  %s1589_s6 = inlined_call_operand.vmem [shape: f32[1,128], index: 6, kind: input, shape index: {}]   ;;  %s1590_s7 = inlined_call_operand.vmem [shape: bf16[128,128], index: 7, kind: input, shape index: {}]   ;;  %s1591_s8 = inlined_call_operand.vmem [shape: f32[1,128], index: 8, kind: input, shape index: {}]   ;;  %s1592_s9 = inlined_call_operand.vmem [shape: f32[8,128], index: 9, kind: output, shape index: {}]  }
   0x1   :  { %s21_s11 = sshll.u32 %s1584_s1, 4  ;;  %s23_s13 = sshll.u32 %s1428_s12, 4  ;;  %s22_s11 = int_to_ptr.hbm [resolvable:$true] %s21_s11  ;;  %s24_s13 = int_to_ptr.vmem [resolvable:$true] %s23_s13 }
   0x2   :  { %s1430_s15 = smov 4  }
   0x3   :  { %29 = dma.hbm_to_vmem [thread:$0]  %s22_s11, 8192, %s24_s13, [#allocation3], %s1429_s14, %s1429_s14, %s1430_s15  }
   0x4   :  { %1426 = dma.done.wait [#allocation3], 8192  }
   0x5   :  { %1427 = vsyncadd [#allocation3], 4294959104  ;;  %v1314_v0 = vld [vmem:[#allocation2 + $0x38] sm:$0xff]  ;;  %v1313_v4 = vld [vmem:[#allocation2 + $0x30] sm:$0xff] }
   0x6   :  { %v1322_v1 = vld [vmem:[#allocation2 + $0x78] sm:$0xff]  ;;  %596 = vmatpush.bf16.msra.mxu0 %v1314_v0  ;;  %v1321_v5 = vld [vmem:[#allocation2 + $0x70] sm:$0xff]  ;;  %v1312_v8 = vld [vmem:[#allocation2 + $0x28] sm:$0xff] }
   0x7   :  { %v1330_v2 = vld [vmem:[#allocation2 + $0xb8] sm:$0xff]  ;;  %609 = vmatpush.bf16.msra.mxu1 %v1322_v1  ;;  %v1329_v6 = vld [vmem:[#allocation2 + $0xb0] sm:$0xff]  ;;  %v1320_v9 = vld [vmem:[#allocation2 + $0x68] sm:$0xff] }
   0x8   :  { %v1338_v3 = vld [vmem:[#allocation2 + $0xf8] sm:$0xff]  ;;  %622 = vmatpush.bf16.msra.mxu2 %v1330_v2  ;;  %v1337_v7 = vld [vmem:[#allocation2 + $0xf0] sm:$0xff]  ;;  %v1328_v10 = vld [vmem:[#allocation2 + $0xa8] sm:$0xff] }
   0x9   :  { %635 = vmatpush.bf16.msra.mxu3 %v1338_v3  ;;  %v1336_v11 = vld [vmem:[#allocation2 + $0xe8] sm:$0xff]  ;;  %v1311_v12 = vld [vmem:[#allocation2 + $0x20] sm:$0xff]  ;;  %v1310_v16 = vld [vmem:[#allocation2 + $0x18] sm:$0xff] }
   0xa   :  { %597 = vmatpush.bf16.msra.mxu0 %v1313_v4  ;;  %v1319_v13 = vld [vmem:[#allocation2 + $0x60] sm:$0xff]  ;;  %v1318_v17 = vld [vmem:[#allocation2 + $0x58] sm:$0xff]  ;;  %v1309_v20 = vld [vmem:[#allocation2 + $0x10] sm:$0xff] }
   0xb   :  { %610 = vmatpush.bf16.msra.mxu1 %v1321_v5  ;;  %v1327_v14 = vld [vmem:[#allocation2 + $0xa0] sm:$0xff]  ;;  %v1326_v18 = vld [vmem:[#allocation2 + $0x98] sm:$0xff]  ;;  %v1317_v21 = vld [vmem:[#allocation2 + $0x50] sm:$0xff] }
   0xc   :  { %623 = vmatpush.bf16.msra.mxu2 %v1329_v6  ;;  %v1335_v15 = vld [vmem:[#allocation2 + $0xe0] sm:$0xff]  ;;  %v1334_v19 = vld [vmem:[#allocation2 + $0xd8] sm:$0xff]  ;;  %v1325_v22 = vld [vmem:[#allocation2 + $0x90] sm:$0xff] }
   0xd   :  { %636 = vmatpush.bf16.msra.mxu3 %v1337_v7  ;;  %v1333_v23 = vld [vmem:[#allocation2 + $0xd0] sm:$0xff]  ;;  %v1308_v24 = vld [vmem:[#allocation2 + $0x8] sm:$0xff]  ;;  %v48_v29 = vld [vmem:[%s1583_s0] sm:$0xff] }
   0xe   :  { %598 = vmatpush.bf16.msra.mxu0 %v1312_v8  ;;  %v1316_v25 = vld [vmem:[#allocation2 + $0x48] sm:$0xff]  ;;  %v1307_v30 = vld [vmem:[#allocation2] sm:$0xff]  ;;  %v188_v33 = vunpack.c.l.b16 %v48_v29  ;;  %v189_v37 = vunpack.c.h.b16 %v48_v29  ;;  %v1346_v38 = vld [vmem:[#allocation2 + $0x138] sm:$0xff] }
   0xf   :  { %611 = vmatpush.bf16.msra.mxu1 %v1320_v9  ;;  %v1324_v26 = vld [vmem:[#allocation2 + $0x88] sm:$0xff]  ;;  %v1315_v31 = vld [vmem:[#allocation2 + $0x40] sm:$0xff]  ;;  %v1354_v39 = vld [vmem:[#allocation2 + $0x178] sm:$0xff] }
  0x10   :  { %624 = vmatpush.bf16.msra.mxu2 %v1328_v10  ;;  %v1332_v27 = vld [vmem:[#allocation2 + $0xc8] sm:$0xff]  ;;  %v1323_v34 = vld [vmem:[#allocation2 + $0x80] sm:$0xff]  ;;  %v1362_v40 = vld [vmem:[#allocation2 + $0x1b8] sm:$0xff]  ;;  %v196_v43 = vpack.c.b16 %v188_v33, %v188_v33  ;;  %v197_v45 = vpack.c.b16 %v189_v37, %v189_v37 }
  0x11   :  { %637 = vmatpush.bf16.msra.mxu3 %v1336_v11  ;;  %v49_v28 = vld [vmem:[%s1583_s0 + $0x8] sm:$0xff]  ;;  %v1331_v35 = vld [vmem:[#allocation2 + $0xc0] sm:$0xff]  ;;  %v1370_v41 = vld [vmem:[#allocation2 + $0x1f8] sm:$0xff] }
  0x12   :  { %599 = vmatpush.bf16.msra.mxu0 %v1311_v12  ;;  %v190_v32 = vunpack.c.l.b16 %v49_v28  ;;  %v191_v36 = vunpack.c.h.b16 %v49_v28  ;;  %v1345_v46 = vld [vmem:[#allocation2 + $0x130] sm:$0xff]  ;;  %v1344_v50 = vld [vmem:[#allocation2 + $0x128] sm:$0xff]  ;;  %v1343_v54 = vld [vmem:[#allocation2 + $0x120] sm:$0xff] }
  0x13   :  { %612 = vmatpush.bf16.msra.mxu1 %v1319_v13  ;;  %v1353_v47 = vld [vmem:[#allocation2 + $0x170] sm:$0xff]  ;;  %v1352_v51 = vld [vmem:[#allocation2 + $0x168] sm:$0xff]  ;;  %v1351_v55 = vld [vmem:[#allocation2 + $0x160] sm:$0xff] }
  0x14   :  { %625 = vmatpush.bf16.msra.mxu2 %v1327_v14  ;;  %v198_v42 = vpack.c.b16 %v190_v32, %v190_v32  ;;  %v199_v44 = vpack.c.b16 %v191_v36, %v191_v36  ;;  %v1361_v48 = vld [vmem:[#allocation2 + $0x1b0] sm:$0xff]  ;;  %v1360_v52 = vld [vmem:[#allocation2 + $0x1a8] sm:$0xff]  ;;  %v1359_v56 = vld [vmem:[#allocation2 + $0x1a0] sm:$0xff] }
  0x15   :  { %638 = vmatpush.bf16.msra.mxu3 %v1335_v15  ;;  %v1369_v49 = vld [vmem:[#allocation2 + $0x1f0] sm:$0xff]  ;;  %v1368_v53 = vld [vmem:[#allocation2 + $0x1e8] sm:$0xff]  ;;  %v1367_v57 = vld [vmem:[#allocation2 + $0x1e0] sm:$0xff] }
  0x16   :  { %600 = vmatpush.bf16.msra.mxu0 %v1310_v16  ;;  %v1342_v58 = vld [vmem:[#allocation2 + $0x118] sm:$0xff]  ;;  %v1341_v62 = vld [vmem:[#allocation2 + $0x110] sm:$0xff]  ;;  %v1340_v2 = vld [vmem:[#allocation2 + $0x108] sm:$0xff] }
  0x17   :  { %613 = vmatpush.bf16.msra.mxu1 %v1318_v17  ;;  %v1350_v59 = vld [vmem:[#allocation2 + $0x158] sm:$0xff]  ;;  %v1349_v63 = vld [vmem:[#allocation2 + $0x150] sm:$0xff]  ;;  %v1348_v3 = vld [vmem:[#allocation2 + $0x148] sm:$0xff] }
  0x18   :  { %626 = vmatpush.bf16.msra.mxu2 %v1326_v18  ;;  %v1358_v60 = vld [vmem:[#allocation2 + $0x198] sm:$0xff]  ;;  %v1357_v0 = vld [vmem:[#allocation2 + $0x190] sm:$0xff]  ;;  %v1356_v5 = vld [vmem:[#allocation2 + $0x188] sm:$0xff] }
  0x19   :  { %639 = vmatpush.bf16.msra.mxu3 %v1334_v19  ;;  %v1366_v61 = vld [vmem:[#allocation2 + $0x1d8] sm:$0xff]  ;;  %v1365_v1 = vld [vmem:[#allocation2 + $0x1d0] sm:$0xff]  ;;  %v1364_v6 = vld [vmem:[#allocation2 + $0x1c8] sm:$0xff] }
  0x1a   :  { %601 = vmatpush.bf16.msra.mxu0 %v1309_v20  ;;  %v50_v4 = vld [vmem:[%s1583_s0 + $0x10] sm:$0xff]  ;;  %v51_v7 = vld [vmem:[%s1583_s0 + $0x18] sm:$0xff]  ;;  %v1339_v10 = vld [vmem:[#allocation2 + $0x100] sm:$0xff] }
  0x1b   :  { %614 = vmatpush.bf16.msra.mxu1 %v1317_v21  ;;  %v192_v8 = vunpack.c.l.b16 %v50_v4  ;;  %v193_v9 = vunpack.c.h.b16 %v50_v4  ;;  %v1347_v11 = vld [vmem:[#allocation2 + $0x140] sm:$0xff]  ;;  %v194_v12 = vunpack.c.l.b16 %v51_v7  ;;  %v195_v13 = vunpack.c.h.b16 %v51_v7  ;;  %v1378_v20 = vld [vmem:[%s1586_s3 + $0x38] sm:$0xff]  ;;  %v1377_v21 = vld [vmem:[%s1586_s3 + $0x30] sm:$0xff] }
  0x1c   :  { %627 = vmatpush.bf16.msra.mxu2 %v1325_v22  ;;  %v1355_v14 = vld [vmem:[#allocation2 + $0x180] sm:$0xff]  ;;  %v1376_v22 = vld [vmem:[%s1586_s3 + $0x28] sm:$0xff]  ;;  %v1389_v4 = vld [vmem:[%s1590_s7 + $0x10] sm:$0xff] }
  0x1d   :  { %640 = vmatpush.bf16.msra.mxu3 %v1333_v23  ;;  %v1363_v15 = vld [vmem:[#allocation2 + $0x1c0] sm:$0xff]  ;;  %v200_v16 = vpack.c.b16 %v192_v8, %v192_v8  ;;  %v201_v17 = vpack.c.b16 %v193_v9, %v193_v9  ;;  %v202_v18 = vpack.c.b16 %v194_v12, %v194_v12  ;;  %v203_v19 = vpack.c.b16 %v195_v13, %v195_v13  ;;  %v1372_v28 = vld [vmem:[%s1586_s3 + $0x8] sm:$0xff] }
  0x1e   :  { %602 = vmatpush.bf16.msra.mxu0 %v1308_v24  ;;  %v1375_v23 = vld [vmem:[%s1586_s3 + $0x20] sm:$0xff]  ;;  %v1374_v24 = vld [vmem:[%s1586_s3 + $0x18] sm:$0xff] }
  0x1f   :  { %615 = vmatpush.bf16.msra.mxu1 %v1316_v25  ;;  %v1371_v32 = vld [vmem:[%s1586_s3] sm:$0xff] }
  0x20   :  { %628 = vmatpush.bf16.msra.mxu2 %v1324_v26  ;;  %v1373_v26 = vld [vmem:[%s1586_s3 + $0x10] sm:$0xff]  ;;  %v1387_v12 = vld [vmem:[%s1590_s7] sm:$0xff] }
  0x21   :  { %641 = vmatpush.bf16.msra.mxu3 %v1332_v27  ;;  %v1400_v13 = vld [vmem:[%s1589_s6] ss:$0 sm:$0xff] }
  0x22   :  { %603 = vmatpush.bf16.msra.mxu0 %v1307_v30 }
  0x23   :  { %616 = vmatpush.bf16.msra.mxu1 %v1315_v31 }
  0x24   :  { %629 = vmatpush.bf16.msra.mxu2 %v1323_v34  ;;  %v1398_v34 = vld [vmem:[%s1585_s2] ss:$0 sm:$0xff] }
  0x25   :  { %642 = vmatpush.bf16.msra.mxu3 %v1331_v35  ;;  %604 = vmatmul.bf16.vlgmr.msra.gmra.mxu0 %v196_v43  ;;  %v1386_v35 = vld [vmem:[%s1588_s5 + $0x38] sm:$0xff] }
  0x26   :  { %648 = vmatpush.bf16.msrb.mxu0 %v1346_v38  ;;  %617 = vmatmul.bf16.vlgmr.msra.gmra.mxu1 %v197_v45  ;;  %v1385_v38 = vld [vmem:[%s1588_s5 + $0x30] sm:$0xff] }
  0x27   :  { %661 = vmatpush.bf16.msrb.mxu1 %v1354_v39  ;;  %630 = vmatmul.bf16.vlgmr.msra.gmra.mxu2 %v198_v42  ;;  %v1383_v42 = vld [vmem:[%s1588_s5 + $0x20] sm:$0xff] }
  0x28   :  { %674 = vmatpush.bf16.msrb.mxu2 %v1362_v40  ;;  %643 = vmatmul.bf16.vlgmr.msra.gmra.mxu3 %v199_v44  ;;  %v1384_v40 = vld [vmem:[%s1588_s5 + $0x28] sm:$0xff]  ;;  %v1382_v44 = vld [vmem:[%s1588_s5 + $0x18] sm:$0xff] }
  0x29   :  { %687 = vmatpush.bf16.msrb.mxu3 %v1370_v41 }
  0x2a   :  { %649 = vmatpush.bf16.msrb.mxu0 %v1345_v46 }
  0x2b   :  { %662 = vmatpush.bf16.msrb.mxu1 %v1353_v47 }
  0x2c   :  { %675 = vmatpush.bf16.msrb.mxu2 %v1361_v48 }
  0x2d   :  { %688 = vmatpush.bf16.msrb.mxu3 %v1369_v49  ;;  %v1381_v49 = vld [vmem:[%s1588_s5 + $0x10] sm:$0xff] }
  0x2e   :  { %650 = vmatpush.bf16.msrb.mxu0 %v1344_v50 }
  0x2f   :  { %663 = vmatpush.bf16.msrb.mxu1 %v1352_v51 }
  0x30   :  { %676 = vmatpush.bf16.msrb.mxu2 %v1360_v52 }
  0x31   :  { %689 = vmatpush.bf16.msrb.mxu3 %v1368_v53 }
  0x32   :  { %651 = vmatpush.bf16.msrb.mxu0 %v1343_v54 }
  0x33   :  { %664 = vmatpush.bf16.msrb.mxu1 %v1351_v55 }
  0x34   :  { %677 = vmatpush.bf16.msrb.mxu2 %v1359_v56 }
  0x35   :  { %690 = vmatpush.bf16.msrb.mxu3 %v1367_v57 }
  0x36   :  { %652 = vmatpush.bf16.msrb.mxu0 %v1342_v58 }
  0x37   :  { %665 = vmatpush.bf16.msrb.mxu1 %v1350_v59 }
  0x38   :  { %678 = vmatpush.bf16.msrb.mxu2 %v1358_v60 }
  0x39   :  { %691 = vmatpush.bf16.msrb.mxu3 %v1366_v61  ;;  %v1380_v61 = vld [vmem:[%s1588_s5 + $0x8] sm:$0xff] }
  0x3a   :  { %653 = vmatpush.bf16.msrb.mxu0 %v1341_v62  ;;  %v1379_v62 = vld [vmem:[%s1588_s5] sm:$0xff] }
  0x3b   :  { %666 = vmatpush.bf16.msrb.mxu1 %v1349_v63  ;;  %v1394_v63 = vld [vmem:[%s1590_s7 + $0x38] sm:$0xff] }
  0x3c   :  { %679 = vmatpush.bf16.msrb.mxu2 %v1357_v0  ;;  %v1393_v0 = vld [vmem:[%s1590_s7 + $0x30] sm:$0xff] }
  0x3d   :  { %692 = vmatpush.bf16.msrb.mxu3 %v1365_v1  ;;  %v1392_v1 = vld [vmem:[%s1590_s7 + $0x28] sm:$0xff] }
  0x3e   :  { %654 = vmatpush.bf16.msrb.mxu0 %v1340_v2  ;;  %v1391_v2 = vld [vmem:[%s1590_s7 + $0x20] sm:$0xff] }
  0x3f   :  { %667 = vmatpush.bf16.msrb.mxu1 %v1348_v3  ;;  %v1390_v3 = vld [vmem:[%s1590_s7 + $0x18] sm:$0xff] }
  0x40   :  { %680 = vmatpush.bf16.msrb.mxu2 %v1356_v5  ;;  %v1399_v5 = vld [vmem:[%s1587_s4] ss:$0 sm:$0xff] }
  0x41   :  { %693 = vmatpush.bf16.msrb.mxu3 %v1364_v6 }
  0x42   :  { %655 = vmatpush.bf16.msrb.mxu0 %v1339_v10 }
  0x43   :  { %668 = vmatpush.bf16.msrb.mxu1 %v1347_v11  ;;  %v1388_v11 = vld [vmem:[%s1590_s7 + $0x8] sm:$0xff] }
  0x44   :  { %681 = vmatpush.bf16.msrb.mxu2 %v1355_v14 }
  0x45   :  { %694 = vmatpush.bf16.msrb.mxu3 %v1363_v15  ;;  %656 = vmatmul.bf16.vlgmr.msrb.gmra.mxu0 %v200_v16 }
  0x46   :  { %669 = vmatmul.bf16.vlgmr.msrb.gmra.mxu1 %v201_v17  ;;  %770 = vmatpush.bf16.msra.mxu0 %v1378_v20 }
  0x47   :  { %682 = vmatmul.bf16.vlgmr.msrb.gmra.mxu2 %v202_v18  ;;  %853 = vmatpush.bf16.msra.mxu1 %v1386_v35 }
  0x48   :  { %695 = vmatmul.bf16.vlgmr.msrb.gmra.mxu3 %v203_v19  ;;  %936 = vmatpush.bf16.msra.mxu2 %v1394_v63  ;;  %v1401_v19 = vld [vmem:[%s1591_s8] ss:$0 sm:$0xff] }
  0x4a   :  { %771 = vmatpush.bf16.msra.mxu0 %v1377_v21 }
  0x4b   :  { %854 = vmatpush.bf16.msra.mxu1 %v1385_v38 }
  0x4c   :  { %937 = vmatpush.bf16.msra.mxu2 %v1393_v0 }
  0x4e   :  { %772 = vmatpush.bf16.msra.mxu0 %v1376_v22 }
  0x4f   :  { %855 = vmatpush.bf16.msra.mxu1 %v1384_v40 }
  0x50   :  { %938 = vmatpush.bf16.msra.mxu2 %v1392_v1 }
  0x52   :  { %773 = vmatpush.bf16.msra.mxu0 %v1375_v23 }
  0x53   :  { %856 = vmatpush.bf16.msra.mxu1 %v1383_v42 }
  0x54   :  { %939 = vmatpush.bf16.msra.mxu2 %v1391_v2 }
  0x56   :  { %774 = vmatpush.bf16.msra.mxu0 %v1374_v24 }
  0x57   :  { %857 = vmatpush.bf16.msra.mxu1 %v1382_v44 }
  0x58   :  { %940 = vmatpush.bf16.msra.mxu2 %v1390_v3 }
  0x5a   :  { %775 = vmatpush.bf16.msra.mxu0 %v1373_v26 }
  0x5b   :  { %858 = vmatpush.bf16.msra.mxu1 %v1381_v49 }
  0x5c   :  { %941 = vmatpush.bf16.msra.mxu2 %v1389_v4 }
  0x5e   :  { %776 = vmatpush.bf16.msra.mxu0 %v1372_v28 }
  0x5f   :  { %859 = vmatpush.bf16.msra.mxu1 %v1380_v61 }
  0x60   :  { %942 = vmatpush.bf16.msra.mxu2 %v1388_v11 }
  0x62   :  { %777 = vmatpush.bf16.msra.mxu0 %v1371_v32 }
  0x63   :  { %860 = vmatpush.bf16.msra.mxu1 %v1379_v62 }
  0x64   :  { %943 = vmatpush.bf16.msra.mxu2 %v1387_v12 }
  0xa2   :  { %v605_v25 = vpop.f32.mrf.mxu0 }
  0xa3   :  { %v618_v27 = vpop.f32.mrf.mxu1  ;;  %v606_v39 = vadd.f32 %v1398_v34, %v605_v25 }
  0xa5   :  { %v619_v41 = vadd.f32 %v618_v27, %v606_v39 }
  0xaa   :  { %v631_v29 = vpop.f32.mrf.mxu2  ;;  %v607_v31 = vpop.f32.mrf.mxu0 }
  0xab   :  { %v644_v30 = vpop.f32.mrf.mxu3  ;;  %v620_v33 = vpop.f32.mrf.mxu1  ;;  %v632_v43 = vadd.f32 %v631_v29, %v619_v41 }
  0xad   :  { %v645_v45 = vadd.f32 %v644_v30, %v632_v43 }
  0xb2   :  { %v633_v36 = vpop.f32.mrf.mxu2 }
  0xb3   :  { %v646_v37 = vpop.f32.mrf.mxu3 }
  0xc2   :  { %v657_v46 = vpop.f32.mrf.mxu0 }
  0xc3   :  { %v670_v47 = vpop.f32.mrf.mxu1  ;;  %v658_v48 = vadd.f32 %v657_v46, %v645_v45 }
  0xc5   :  { %v671_v50 = vadd.f32 %v670_v47, %v658_v48 }
  0xca   :  { %v683_v51 = vpop.f32.mrf.mxu2  ;;  %v659_v54 = vpop.f32.mrf.mxu0 }
  0xcb   :  { %v696_v52 = vpop.f32.mrf.mxu3  ;;  %v684_v53 = vadd.f32 %v683_v51, %v671_v50  ;;  %v672_v55 = vpop.f32.mrf.mxu1 }
  0xcd   :  { %v697_v56 = vadd.f32 %v696_v52, %v684_v53 }
  0xcf   :  { %v700_v57 = vmax.f32 %v697_v56, 0.0 }
  0xd1   :  { %v701_v58 = vpack.c.bf16 %v700_v57, %v700_v57 }
  0xd2   :  { %v685_v59 = vpop.f32.mrf.mxu2 }
  0xd3   :  { %v698_v60 = vpop.f32.mrf.mxu3  ;;  %778 = vmatmul.bf16.vlgmr.msra.gmra.mxu0 %v701_v58 }
 0x150   :  { %v779_v6 = vpop.f32.mrf.mxu0 }
 0x151   :  { %v780_v7 = vadd.f32 %v1399_v5, %v779_v6 }
 0x153   :  { %v783_v8 = vmax.f32 %v780_v7, 0.0 }
 0x155   :  { %v784_v9 = vpack.c.bf16 %v783_v8, %v783_v8 }
 0x157   :  { %861 = vmatmul.bf16.vlgmr.msra.gmra.mxu1 %v784_v9 }
 0x158   :  { %v781_v10 = vpop.f32.mrf.mxu0 }
 0x1d4   :  { %v862_v14 = vpop.f32.mrf.mxu1 }
 0x1d5   :  { %v863_v15 = vadd.f32 %v1400_v13, %v862_v14 }
 0x1d7   :  { %v866_v16 = vmax.f32 %v863_v15, 0.0 }
 0x1d9   :  { %v867_v17 = vpack.c.bf16 %v866_v16, %v866_v16 }
 0x1db   :  { %944 = vmatmul.bf16.vlgmr.msra.gmra.mxu2 %v867_v17 }
 0x1dc   :  { %v864_v18 = vpop.f32.mrf.mxu1 }
 0x25e   :  { %v945_v20 = vpop.f32.mrf.mxu2 }
 0x25f   :  { %v946_v21 = vadd.f32 %v1401_v19, %v945_v20 }
 0x261   :  { %949 = vst [vmem:[%s1592_s9] sm:$0xff] %v946_v21 }
 0x266   :  { %v947_v22 = vpop.f32.mrf.mxu2 }
 0x267   :  { %954 = vsyncpa [#allocation3], 1 }

</bundles_post_ra>
